<compile_context>
chip_gen: v7x
topology: tpu7x:2x2x1
jax: 0.10.0
libtpu: 0.0.40
codegen_flags: <defaults>
</compile_context>

<pallas_src>
import math
import functools

import jax
import jax.numpy as jnp
from jax.experimental import pallas as pl
from jax.experimental.pallas import tpu as pltpu


def _round_up(x, m):
    return ((x + m - 1) // m) * m


def _cdiv(a, b):
    return (a + b - 1) // b


# ---------------------------------------------------------------------------
# Kernel 1: support = (X [* mask]) @ W   (hoisted out of the row-tile loop)
# ---------------------------------------------------------------------------
def _support_kernel(x_ref, w_ref, o_ref):
    x = x_ref[...].astype(w_ref.dtype)
    o_ref[...] = jnp.dot(
        x, w_ref[...], preferred_element_type=jnp.float32
    ).astype(o_ref.dtype)


def _support_mask_kernel(x_ref, m_ref, w_ref, o_ref):
    # Feature dropout fused into the dot: elementwise in f32, cast once for MXU.
    x = (x_ref[...] * m_ref[...]).astype(w_ref.dtype)
    o_ref[...] = jnp.dot(
        x, w_ref[...], preferred_element_type=jnp.float32
    ).astype(o_ref.dtype)


def compute_support(X, W, mask=None, *, tm, out_dtype):
    """support = (X [* mask]) @ W, row-tiled; W padded to lane-dense columns."""
    n, f_in = X.shape
    f_out = W.shape[1]
    assert n % tm == 0
    grid = (n // tm,)
    x_spec = pl.BlockSpec((tm, f_in), lambda i: (i, 0))
    w_spec = pl.BlockSpec((f_in, f_out), lambda i: (0, 0))
    o_spec = pl.BlockSpec((tm, f_out), lambda i: (i, 0))
    cp = pltpu.CompilerParams(dimension_semantics=("parallel",))
    out_shape = jax.ShapeDtypeStruct((n, f_out), out_dtype)
    if mask is None:
        return pl.pallas_call(
            _support_kernel, out_shape=out_shape, grid=grid,
            in_specs=[x_spec, w_spec], out_specs=o_spec, compiler_params=cp,
        )(X, W)
    m_spec = pl.BlockSpec((tm, f_in), lambda i: (i, 0))
    return pl.pallas_call(
        _support_mask_kernel, out_shape=out_shape, grid=grid,
        in_specs=[x_spec, m_spec, w_spec], out_specs=o_spec, compiler_params=cp,
    )(X, mask, W)


# ---------------------------------------------------------------------------
# Kernel 2: out = relu?( ((S*D)*A) @ support + b ), K-blocked over N
# ---------------------------------------------------------------------------
def _gcn_layer_kernel(a_ref, s_ref, d_ref, sup_ref, b_ref, o_ref, acc_ref,
                      *, apply_relu):
    k = pl.program_id(1)

    @pl.when(k == 0)
    def _():
        acc_ref[...] = jnp.zeros_like(acc_ref)

    # Elementwise edge masking (VPU, slack under the MXU) then one MXU matmul.
    a_prime = s_ref[...] * d_ref[...] * a_ref[...]
    acc_ref[...] += jnp.dot(
        a_prime.astype(sup_ref.dtype), sup_ref[...],
        preferred_element_type=jnp.float32,
    )

    @pl.when(k == pl.num_programs(1) - 1)
    def _():
        y = acc_ref[...] + b_ref[...]          # bias fused
        if apply_relu:                          # relu fused (mid layers)
            y = jnp.maximum(y, 0.0)
        o_ref[...] = y.astype(o_ref.dtype)


def gcn_dropedge_layer(A, S, Dblocks, support, b, *, tm, tk,
                       n_doc_row_blocks, n_doc_col_blocks, apply_relu):
    """One GCN_DropEdgeLearn_Layer: relu?(((S*D)*A) @ support + b)."""
    n = A.shape[0]
    f_pad = support.shape[1]
    assert n % tm == 0 and n % tk == 0
    grid = (n // tm, n // tk)

    # Tiles outside the doc-doc region are clamped onto the spare all-ones block
    # at block index (n_doc_row_blocks, n_doc_col_blocks); Pallas dedups repeated
    # block indices, so D HBM traffic is ~O(num_docs * N), not O(N^2).
    d_row_clamp = n_doc_row_blocks
    d_col_clamp = n_doc_col_blocks

    kernel = functools.partial(_gcn_layer_kernel, apply_relu=apply_relu)
    return pl.pallas_call(
        kernel,
        out_shape=jax.ShapeDtypeStruct((n, f_pad), jnp.float32),
        grid=grid,
        in_specs=[
            pl.BlockSpec((tm, tk), lambda i, k: (i, k)),                 # A
            pl.BlockSpec((tm, tk), lambda i, k: (i, k)),                 # S
            pl.BlockSpec((tm, tk),
                         lambda i, k: (jnp.minimum(i, d_row_clamp),
                                       jnp.minimum(k, d_col_clamp))),    # D blocks
            pl.BlockSpec((tk, f_pad), lambda i, k: (k, 0)),              # support
            pl.BlockSpec((1, f_pad), lambda i, k: (0, 0)),               # bias
        ],
        out_specs=pl.BlockSpec((tm, f_pad), lambda i, k: (i, 0)),
        scratch_shapes=[pltpu.VMEM((tm, f_pad), jnp.float32)],
        compiler_params=pltpu.CompilerParams(
            dimension_semantics=("parallel", "arbitrary")),
    )(A, S, Dblocks, support, b)


# ---------------------------------------------------------------------------
# Parameter init (matches GCN_DropEdgeLearn_Layer.reset_parameters)
# ---------------------------------------------------------------------------
def init_layer_params(key, num_docs, num_tokens, emb_dim, out_dim):
    n = num_docs + num_tokens
    k_w, k_b, k_s = jax.random.split(key, 3)
    stdv = 1.0 / math.sqrt(out_dim)                       # uniform_(-stdv, stdv)
    W = jax.random.uniform(k_w, (emb_dim, out_dim), jnp.float32, -stdv, stdv)
    b = jax.random.uniform(k_b, (1, out_dim), jnp.float32, -stdv, stdv)
    xavier = math.sqrt(6.0 / (n + n))                     # xavier_uniform_ on (n, n)
    S = jax.random.uniform(k_s, (n, n), jnp.float32, -xavier, xavier)
    return {"W": W, "b": b, "S": S}


def init_model_params(key, num_docs, num_tokens, in_dim, hidden_dim, out_dim,
                      num_layer=2):
    keys = jax.random.split(key, num_layer)
    return {
        "layer1": init_layer_params(keys[0], num_docs, num_tokens, in_dim, hidden_dim),
        "mid": [
            init_layer_params(keys[1 + i], num_docs, num_tokens, hidden_dim, hidden_dim)
            for i in range(num_layer - 2)
        ],
        "layern": init_layer_params(keys[-1], num_docs, num_tokens, hidden_dim, out_dim),
    }


# ---------------------------------------------------------------------------
# Dropout helpers (stochastic parts of the torch forward, fixed RNG keys)
# ---------------------------------------------------------------------------
def make_targeted_dropout_blocks(key, num_docs, p, tm, tk, dtype):
    """Doc-doc targeted dropout, stored as a tiny block grid (not (N, N)).

    Block rows/cols 0..ceil(d/t)-1 hold the dropout values (ones-padded); one
    extra all-ones block row/col is appended for non-doc tiles to clamp onto.
    """
    ndr = _cdiv(num_docs, tm) if num_docs > 0 else 0
    ndc = _cdiv(num_docs, tk) if num_docs > 0 else 0
    D = jnp.ones(((ndr + 1) * tm, (ndc + 1) * tk), jnp.float32)
    if num_docs > 0 and p > 0.0:
        keep = jax.random.bernoulli(key, 1.0 - p, (num_docs, num_docs))
        doc = keep.astype(jnp.float32) / (1.0 - p)
        D = D.at[:num_docs, :num_docs].set(doc)
    return D.astype(dtype), ndr, ndc


def feature_dropout_mask(key, shape, p):
    keep = jax.random.bernoulli(key, 1.0 - p, shape)
    return keep.astype(jnp.float32) / (1.0 - p)


# ---------------------------------------------------------------------------
# Model forward (GCN_DropEdgeLearn_Model.forward)
# ---------------------------------------------------------------------------
def gcn_dropedgelearn_model_forward(params, A, X, *, num_docs, dropout=0.2,
                                    targeted_drop=0.1, training=True, rng=None,
                                    tm=256, tk=512,
                                    compute_dtype=jnp.bfloat16):
    n = A.shape[0]
    tm = min(tm, n)
    tk = min(tk, n)
    assert n % tm == 0 and n % tk == 0, "row/contraction tiles must divide N"
    # TODO(synk): for graph sizes not divisible by tm/tk, pad A/S/X rows with zeros.

    layers = [params["layer1"], *params["mid"], params["layern"]]
    num_gcn = len(layers)
    keys = jax.random.split(rng, num_gcn + 1)
    out_dim_final = params["layern"]["W"].shape[1]

    A_c = A.astype(compute_dtype)       # halve the dominant N^2 HBM stream
    feat_mask = None                    # pending F.dropout mask (fused into next X@W)

    for li, lp in enumerate(layers):
        W, b, S = lp["W"], lp["b"], lp["S"]
        f_in, f_out = W.shape
        f_in_pad = X.shape[1]                       # inputs already zero-padded cols
        f_out_pad = _round_up(f_out, 128)           # lane-dense output / bias
        Wp = jnp.pad(W, ((0, f_in_pad - f_in),
                         (0, f_out_pad - f_out))).astype(compute_dtype)
        bp = jnp.pad(b, ((0, 0), (0, f_out_pad - f_out))).astype(jnp.float32)

        # support = (X [* dropout mask]) @ W, computed once per layer.
        support = compute_support(X, Wp, mask=feat_mask, tm=tm,
                                  out_dtype=compute_dtype)
        feat_mask = None

        # Targeted dropout is always active in the reference layer (fresh Dropout
        # module in forward()), independent of the model's `training` flag.
        Dblk, ndr, ndc = make_targeted_dropout_blocks(
            keys[li], num_docs, targeted_drop, tm, tk, compute_dtype)

        apply_relu = (0 < li < num_gcn - 1)         # torch.relu after mid layers
        X = gcn_dropedge_layer(
            A_c, S.astype(compute_dtype), Dblk, support, bp,
            tm=tm, tk=tk, n_doc_row_blocks=ndr, n_doc_col_blocks=ndc,
            apply_relu=apply_relu)

        if li == 0 and training and dropout > 0.0:
            # F.dropout after layer 1; fused into the next layer's support matmul.
            feat_mask = feature_dropout_mask(keys[-1], X.shape, dropout)

    return X[:, :out_dim_final]


# ---------------------------------------------------------------------------
# Pure-JAX reference (deterministic path) for a correctness sanity check
# ---------------------------------------------------------------------------
def _reference_forward_nodrop(params, A, X):
    layers = [params["layer1"], *params["mid"], params["layern"]]
    L = len(layers)
    H = X
    for li, lp in enumerate(layers):
        support = H @ lp["W"]
        H = (lp["S"] * A) @ support + lp["b"]
        if 0 < li < L - 1:
            H = jnp.maximum(H, 0.0)
    return H


# ---------------------------------------------------------------------------
# Driver
# ---------------------------------------------------------------------------
if __name__ == "__main__":
    # Small shapes consistent with the module: N = num_docs + num_tokens nodes.
    num_docs, num_tokens = 16, 112          # N = 128
    in_dim, hidden_dim, out_dim = 32, 32, 8
    num_layer = 3                           # layer1 -> dropout -> mid(+relu) -> layern
    n = num_docs + num_tokens

    root = jax.random.PRNGKey(0)
    k_params, k_A, k_X, k_fwd = jax.random.split(root, 4)

    params = init_model_params(k_params, num_docs, num_tokens,
                               in_dim, hidden_dim, out_dim, num_layer=num_layer)

    A = jax.random.uniform(k_A, (n, n), jnp.float32)
    A = 0.5 * (A + A.T)                                  # symmetric, like a graph
    X = jax.random.normal(k_X, (n, in_dim), jnp.float32)

    # 1) Correctness sanity check: deterministic path (no dropout), f32 compute.
    out_det = gcn_dropedgelearn_model_forward(
        params, A, X, num_docs=num_docs, dropout=0.0, targeted_drop=0.0,
        training=False, rng=k_fwd, tm=256, tk=512, compute_dtype=jnp.float32)
    out_det = jax.block_until_ready(out_det)
    ref = _reference_forward_nodrop(params, A, X)
    assert out_det.shape == ref.shape
    assert bool(jnp.allclose(out_det, ref, rtol=5e-2, atol=5e-2)), \
        float(jnp.max(jnp.abs(out_det - ref)))

    # 2) Full stochastic forward (bf16 operands on the N^2 streams).
    out = gcn_dropedgelearn_model_forward(
        params, A, X, num_docs=num_docs, dropout=0.2, targeted_drop=0.1,
        training=True, rng=k_fwd, tm=256, tk=512, compute_dtype=jnp.bfloat16)
    out = jax.block_until_ready(out)

    assert out.shape == (n, out_dim), out.shape
    assert out.dtype == jnp.float32
    assert bool(jnp.all(jnp.isfinite(out)))
    print("KERNEL_OK")
</pallas_src>

<mosaic_0001>
module attributes {stable_mosaic.version = 11 : i64} {
  func.func @_support_kernel(%arg0: i32, %arg1: memref<128x32xf32, #tpu.memory_space<vmem>>, %arg2: memref<32x128xf32, #tpu.memory_space<vmem>>, %arg3: memref<128x128xf32, #tpu.memory_space<vmem>>) attributes {dimension_semantics = [#tpu.dimension_semantics<parallel>], iteration_bounds = array<i64: 1>, scalar_prefetch = 0 : i64, scratch_operands = 0 : i64, tpu.core_type = #tpu.core_type<tc>, window_params = [{transform_indices = @transform_0, window_bounds = array<i64: 128, 32>}, {pipeline_mode = #tpu.pipeline_mode<synchronous>, transform_indices = @transform_1, window_bounds = array<i64: 32, 128>}, {transform_indices = @transform_2, window_bounds = array<i64: 128, 128>}]} {
    %c0 = arith.constant 0 : index
    %c0_0 = arith.constant 0 : index
    %0 = vector.load %arg1[%c0, %c0_0] : memref<128x32xf32, #tpu.memory_space<vmem>>, vector<128x32xf32>
    %c0_1 = arith.constant 0 : index
    %c0_2 = arith.constant 0 : index
    %1 = vector.load %arg2[%c0_1, %c0_2] : memref<32x128xf32, #tpu.memory_space<vmem>>, vector<32x128xf32>
    %cst = arith.constant dense<0.000000e+00> : vector<128x128xf32>
    %2 = tpu.matmul %0, %1, %cst {dimension_numbers = #tpu.dot_dimension_numbers<[1], [0], [0], [1], [0, 0, 1, 1], [], []>} : vector<128x32xf32>, vector<32x128xf32>, vector<128x128xf32> -> vector<128x128xf32>
    %c0_3 = arith.constant 0 : index
    %c0_4 = arith.constant 0 : index
    %3 = vector.load %arg3[%c0_3, %c0_4] : memref<128x128xf32, #tpu.memory_space<vmem>>, vector<128x128xf32>
    tpu.vector_store %arg3[%c0_3, %c0_4], %2 {strides = array<i32>} : memref<128x128xf32, #tpu.memory_space<vmem>>, vector<128x128xf32>,
    return
  }
  func.func @transform_0(%arg0: i32) -> (i32, i32) {
    %c0_i32 = arith.constant 0 : i32
    %c0_i32_0 = arith.constant 0 : i32
    return %arg0, %c0_i32 : i32, i32
  }
  func.func @transform_1(%arg0: i32) -> (i32, i32) {
    %c0_i32 = arith.constant 0 : i32
    %c0_i32_0 = arith.constant 0 : i32
    %c0_i32_1 = arith.constant 0 : i32
    return %c0_i32, %c0_i32_0 : i32, i32
  }
  func.func @transform_2(%arg0: i32) -> (i32, i32) {
    %c0_i32 = arith.constant 0 : i32
    %c0_i32_0 = arith.constant 0 : i32
    return %arg0, %c0_i32 : i32, i32
  }
}

</mosaic_0001>

<bundles_post_ra>
// kernel: tpu_custom_call.1
= control target key start
LH: loop header
LB: loop body
LE: loop exit
PB: predicated region body
PF: predicated region fallthrough
CT: control target
= control target key end

     0   :  { %vm32_vm0 = vcmask 261120   ;;  %s471_s0 = inlined_call_operand.vmem [shape: f32[128,32], index: 0, kind: input, shape index: {}]   ;;  %s472_s1 = inlined_call_operand.vmem [shape: f32[32,128], index: 1, kind: input, shape index: {}]   ;;  %s473_s2 = inlined_call_operand.hbm [shape: f32[128,128], index: 2, kind: output, shape index: {}]  }
   0x1   :  { %v28_v0 = vld [vmem:[%s472_s1] sm:$0xff]  ;;  %v29_v1 = vld [vmem:[%s472_s1 + $0x8] sm:$0xff]  ;;  %v30_v2 = vld [vmem:[%s472_s1 + $0x10] sm:$0xff] }
   0x2   :  { %v326_v3 = vpack.c.bf16 %v29_v1, %v28_v0  ;;  %v31_v4 = vld [vmem:[%s472_s1 + $0x18] sm:$0xff]  ;;  %v12_v5 = vld [vmem:[%s471_s0] sm:$0xff] }
   0x3   :  { %v20_v6 = vld [vmem:[%s471_s0 + $0x40] sm:$0xff]  ;;  %v330_v7 = vpack.c.bf16 %v31_v4, %v30_v2  ;;  %302 = vmatprep.mubr.msk.f32.mxu0 %vm32_vm0, %v12_v5 }
   0x4   :  { %314 = vmatprep.mubr.msk.f32.mxu1 %vm32_vm0, %v20_v6  ;;  %327 = vmatprep.subr.bf16.mxu0 %v326_v3 }
   0x5   :  { %334 = vmatprep.subr.bf16.mxu1 %v326_v3  ;;  %329 = vmatpush3.bf16.msra.mxu0 %v326_v3 }
   0x6   :  { %336 = vmatpush3.bf16.msra.mxu1 %v326_v3  ;;  %331 = vmatprep.subr.bf16.mxu0 %v330_v7 }
   0x7   :  { %335 = vmatprep.subr.bf16.mxu1 %v330_v7 }
   0x8   :  { %7 = vsyncpa [#allocation3], 0  ;;  %v13_v8 = vld [vmem:[%s471_s0 + $0x8] sm:$0xff]  ;;  %v14_v10 = vld [vmem:[%s471_s0 + $0x10] sm:$0xff] }
   0x9   :  { %333 = vmatpush3.bf16.msra.mxu0 %v330_v7  ;;  %v21_v9 = vld [vmem:[%s471_s0 + $0x48] sm:$0xff]  ;;  %v22_v11 = vld [vmem:[%s471_s0 + $0x50] sm:$0xff]  ;;  %v15_v12 = vld [vmem:[%s471_s0 + $0x18] sm:$0xff] }
   0xa   :  { %337 = vmatpush3.bf16.msra.mxu1 %v330_v7  ;;  %v23_v13 = vld [vmem:[%s471_s0 + $0x58] sm:$0xff]  ;;  %v16_v14 = vld [vmem:[%s471_s0 + $0x20] sm:$0xff]  ;;  %v17_v16 = vld [vmem:[%s471_s0 + $0x28] sm:$0xff] }
   0xb   :  { %v24_v15 = vld [vmem:[%s471_s0 + $0x60] sm:$0xff]  ;;  %v25_v17 = vld [vmem:[%s471_s0 + $0x68] sm:$0xff]  ;;  %v18_v18 = vld [vmem:[%s471_s0 + $0x30] sm:$0xff] }
   0xc   :  { %303 = vmatmul.mubr.msk.f32.vlgmr.msra.gmra.mrb[0].mxu0 %vm32_vm0, %v13_v8  ;;  %v26_v19 = vld [vmem:[%s471_s0 + $0x70] sm:$0xff]  ;;  %v19_v20 = vld [vmem:[%s471_s0 + $0x38] sm:$0xff] }
   0xd   :  { %315 = vmatmul.mubr.msk.f32.vlgmr.msra.gmra.mrb[0].mxu1 %vm32_vm0, %v21_v9  ;;  %305 = vmatprep.mubr.msk.f32.mxu0 %vm32_vm0, %v14_v10  ;;  %v27_v21 = vld [vmem:[%s471_s0 + $0x78] sm:$0xff]  ;;  %s365_s0 = smov [#allocation2]  }
   0xe   :  { %317 = vmatprep.mubr.msk.f32.mxu1 %vm32_vm0, %v22_v11  ;;  %s247_s20 = sshll.u32 %s365_s0, 4  ;;  %s248_s20 = int_to_ptr.vmem [resolvable:$true] %s247_s20 }
   0xf   :  { %s341_s1 = scalar_lea.vmem %s248_s20, 2048  ;;  %p346_p1 = scmp.lt.s32.totalorder %s248_s20, %s248_s20 }
  0x10   :  { %306 = vmatmul.mubr.msk.f32.gmra.mrb[2].mxu0 %vm32_vm0, %v15_v12  ;;  %p342_p0 = scmp.ne.s32.totalorder %s248_s20, %s341_s1  ;;  %p347_p2 = scmp.lt.s32.totalorder %s341_s1, %s341_s1 }
  0x11   :  { %318 = vmatmul.mubr.msk.f32.gmra.mrb[2].mxu1 %vm32_vm0, %v23_v13  ;;  %308 = vmatprep.mubr.msk.f32.mxu0 %vm32_vm0, %v16_v14 }
  0x12   :  { %320 = vmatprep.mubr.msk.f32.mxu1 %vm32_vm0, %v24_v15  ;;  %p348_p3 = por %p347_p2, %p346_p1 }
  0x14   :  { %309 = vmatmul.mubr.msk.f32.gmra.mrb[4].mxu0 %vm32_vm0, %v17_v16  ;;  %p349_p4 = pnand %p348_p3, %p342_p0 }
  0x15   :  { %321 = vmatmul.mubr.msk.f32.gmra.mrb[4].mxu1 %vm32_vm0, %v25_v17  ;;  %311 = vmatprep.mubr.msk.f32.mxu0 %vm32_vm0, %v18_v18 }
  0x16   :  { %323 = vmatprep.mubr.msk.f32.mxu1 %vm32_vm0, %v26_v19 }
  0x18   :  { %312 = vmatmul.mubr.msk.f32.gmra.mrb[6].mxu0 %vm32_vm0, %v19_v20 }
  0x19   :  { %324 = vmatmul.mubr.msk.f32.gmra.mrb[6].mxu1 %vm32_vm0, %v27_v21 }
  0xdf   :  { %v304_v22 = vpop.f32.mrb[0].mxu0 }
  0xe0   :  { %v316_v23 = vpop.f32.mrb[0].mxu1  ;;  %227 = vst [vmem:[#allocation2 + $0x8] sm:$0xff] %v304_v22  ;;  %v147_v24 = vpop.f32.mrb[1].mxu0 }
  0xe1   :  { %235 = vst [vmem:[#allocation2 + $0x48] sm:$0xff] %v316_v23  ;;  %v187_v25 = vpop.f32.mrb[1].mxu1  ;;  %226 = vst [vmem:[#allocation2] sm:$0xff] %v147_v24 }
  0xe2   :  { %234 = vst [vmem:[#allocation2 + $0x40] sm:$0xff] %v187_v25 }
  0xe3   :  { %v307_v26 = vpop.f32.mrb[2].mxu0 }
  0xe4   :  { %v319_v27 = vpop.f32.mrb[2].mxu1  ;;  %229 = vst [vmem:[#allocation2 + $0x18] sm:$0xff] %v307_v26  ;;  %v157_v28 = vpop.f32.mrb[3].mxu0 }
  0xe5   :  { %237 = vst [vmem:[#allocation2 + $0x58] sm:$0xff] %v319_v27  ;;  %v197_v29 = vpop.f32.mrb[3].mxu1  ;;  %228 = vst [vmem:[#allocation2 + $0x10] sm:$0xff] %v157_v28 }
  0xe6   :  { %236 = vst [vmem:[#allocation2 + $0x50] sm:$0xff] %v197_v29 }
  0xe7   :  { %v310_v30 = vpop.f32.mrb[4].mxu0 }
  0xe8   :  { %v322_v31 = vpop.f32.mrb[4].mxu1  ;;  %231 = vst [vmem:[#allocation2 + $0x28] sm:$0xff] %v310_v30  ;;  %v167_v32 = vpop.f32.mrb[5].mxu0 }
  0xe9   :  { %239 = vst [vmem:[#allocation2 + $0x68] sm:$0xff] %v322_v31  ;;  %v207_v33 = vpop.f32.mrb[5].mxu1  ;;  %230 = vst [vmem:[#allocation2 + $0x20] sm:$0xff] %v167_v32 }
  0xea   :  { %238 = vst [vmem:[#allocation2 + $0x60] sm:$0xff] %v207_v33 }
  0xeb   :  { %v313_v34 = vpop.f32.mrb[6].mxu0 }
  0xec   :  { %v325_v35 = vpop.f32.mrb[6].mxu1  ;;  %233 = vst [vmem:[#allocation2 + $0x38] sm:$0xff] %v313_v34  ;;  %v177_v36 = vpop.f32.mrb[7].mxu0 }
  0xed   :  { %241 = vst [vmem:[#allocation2 + $0x78] sm:$0xff] %v325_v35  ;;  %v217_v37 = vpop.f32.mrb[7].mxu1  ;;  %232 = vst [vmem:[#allocation2 + $0x30] sm:$0xff] %v177_v36 }
  0xee   :  { %240 = vst [vmem:[#allocation2 + $0x70] sm:$0xff] %v217_v37 }
  0xef   :  { %352 = shalt.err (!%p349_p4)
}
  0xf0   :  { %s353_s23 = scalar_lea.hbm %s473_s2, 2048 }
  0xf1   :  { %p354_p5 = scmp.ne.s32.totalorder %s473_s2, %s353_s23  ;;  %p357_p6 = scmp.lt.u32.totalorder %s353_s23, %s473_s2 }
  0xf3   :  { %p359_p7 = pnand %p357_p6, %p354_p5 }
  0xf5   :  { %362 = shalt.err (!%p359_p7)
}
  0xf6   :  { %s366_s28 = smov 128   ;;  %s367_s29 = smov 8  }
  0xf7   :  { %253 = dma.vmem_to_hbm [thread:$0]  %s248_s20, 2048, %s473_s2, [#allocation3], %s366_s28, %s366_s28, %s367_s29  }
  0xf8   :  { %363 = dma.done.wait [#allocation3], 2048  }
  0xf9   :  { %364 = vsyncadd [#allocation3], 4294965248 }
  0xfa   :  { %257 = vsyncpa [#allocation3], 1 }

</bundles_post_ra>
